<compile_context>
chip_gen: v7x
topology: tpu7x:2x2x1
jax: 0.10.0
libtpu: 0.0.40
codegen_flags: <defaults>
</compile_context>

<pallas_src>
import functools

import jax
import jax.numpy as jnp
from jax.experimental import pallas as pl
from jax.experimental.pallas import tpu as pltpu  # noqa: F401  (TPU backend)


def cbow_kernel(x_ref, w1t_ref, b1_ref, w2t_ref, b2_ref, out_ref, *, batch, context):
    # x_ref:   (B*C, V) bf16  flattened context bag-of-words vectors
    # w1t_ref: (V, H)   bf16  W1.weight transposed
    # b1_ref:  (1, H)   f32   W1.bias
    # w2t_ref: (H, V)   bf16  W2.weight transposed
    # b2_ref:  (1, V)   f32   W2.bias
    # out_ref: (B, V)   f32   score vector (pre-log-softmax, exactly like forward())
    h = jnp.dot(x_ref[...], w1t_ref[...], preferred_element_type=jnp.float32)
    h = jnp.maximum(h + b1_ref[...], 0.0)                      # ReLU(W1 x + b1), fp32

    # mean over the context axis as a cheap sublane reduce (no MXU op, no extra DMA)
    hidden = h.shape[-1]
    mean_h = h.reshape(batch, context, hidden).sum(axis=1) * (1.0 / context)

    scores = jnp.dot(mean_h.astype(w2t_ref.dtype), w2t_ref[...],
                     preferred_element_type=jnp.float32) + b2_ref[...]
    out_ref[...] = scores.astype(out_ref.dtype)


def cbow_forward(context_words, w1, b1, w2, b2):
    """context_words: (B, C, V) float32. w1: (H, V), b1: (H,), w2: (V, H), b2: (V,)."""
    B, C, V = context_words.shape
    H = w1.shape[0]

    # bf16 matmul operands (MXU-native on v5e/v6e/v7x), fp32 biases + accumulation.
    x_flat = context_words.reshape(B * C, V).astype(jnp.bfloat16)
    w1t = w1.T.astype(jnp.bfloat16)                  # (V, H)
    w2t = w2.T.astype(jnp.bfloat16)                  # (H, V)
    b1r = b1.reshape(1, H).astype(jnp.float32)
    b2r = b2.reshape(1, V).astype(jnp.float32)

    full = lambda shape: pl.BlockSpec(shape, lambda: tuple(0 for _ in shape))

    return pl.pallas_call(
        functools.partial(cbow_kernel, batch=B, context=C),
        out_shape=jax.ShapeDtypeStruct((B, V), jnp.float32),
        in_specs=[
            full((B * C, V)),
            full((V, H)),
            full((1, H)),
            full((H, V)),
            full((1, V)),
        ],
        out_specs=full((B, V)),
    )(x_flat, w1t, b1r, w2t, b2r)


if __name__ == "__main__":
    # Small shapes consistent with the module: vocab=128, hidden=32, batch=2, context=4
    vocab_size, hidden_size = 128, 32
    B, C = 2, 4

    key = jax.random.PRNGKey(0)
    k_x, k_w1, k_b1, k_w2, k_b2 = jax.random.split(key, 5)

    # Deterministic parameter init (mimic PyTorch Linear uniform(-1/sqrt(fan_in), ...))
    lim1 = 1.0 / (vocab_size ** 0.5)
    lim2 = 1.0 / (hidden_size ** 0.5)
    w1 = jax.random.uniform(k_w1, (hidden_size, vocab_size), jnp.float32, -lim1, lim1)
    b1 = jax.random.uniform(k_b1, (hidden_size,), jnp.float32, -lim1, lim1)
    w2 = jax.random.uniform(k_w2, (vocab_size, hidden_size), jnp.float32, -lim2, lim2)
    b2 = jax.random.uniform(k_b2, (vocab_size,), jnp.float32, -lim2, lim2)

    # context_words: dense bag-of-words style float input, shape (B, C, V)
    context_words = jax.random.uniform(k_x, (B, C, vocab_size), jnp.float32)

    out = jax.block_until_ready(cbow_forward(context_words, w1, b1, w2, b2))

    # Pure-JAX fp32 reference for sanity (tolerance relaxed for bf16 matmul inputs,
    # accumulation stays fp32 so the error is only input/weight rounding).
    ref_h = jax.nn.relu(jnp.einsum("bcv,hv->bch", context_words, w1) + b1)
    ref = jnp.einsum("bh,vh->bv", jnp.mean(ref_h, axis=1), w2) + b2
    assert out.shape == (B, vocab_size)
    assert jnp.allclose(out, ref, atol=3e-2, rtol=3e-2)

    print("KERNEL_OK")
</pallas_src>

<mosaic_0001>
module attributes {stable_mosaic.version = 11 : i64} {
  func.func @cbow_kernel(%arg0: memref<8x128xbf16, #tpu.memory_space<vmem>>, %arg1: memref<128x32xbf16, #tpu.memory_space<vmem>>, %arg2: memref<1x32xf32, #tpu.memory_space<vmem>>, %arg3: memref<32x128xbf16, #tpu.memory_space<vmem>>, %arg4: memref<1x128xf32, #tpu.memory_space<vmem>>, %arg5: memref<2x128xf32, #tpu.memory_space<vmem>>) attributes {dimension_semantics = [], scalar_prefetch = 0 : i64, scratch_operands = 0 : i64, tpu.core_type = #tpu.core_type<tc>} {
    %c0 = arith.constant 0 : index
    %c0_0 = arith.constant 0 : index
    %0 = vector.load %arg0[%c0, %c0_0] : memref<8x128xbf16, #tpu.memory_space<vmem>>, vector<8x128xbf16>
    %c0_1 = arith.constant 0 : index
    %c0_2 = arith.constant 0 : index
    %1 = vector.load %arg1[%c0_1, %c0_2] : memref<128x32xbf16, #tpu.memory_space<vmem>>, vector<128x32xbf16>
    %cst = arith.constant dense<0.000000e+00> : vector<8x32xf32>
    %2 = tpu.matmul %0, %1, %cst {dimension_numbers = #tpu.dot_dimension_numbers<[1], [0], [0], [1], [0, 0, 1, 1], [], []>} : vector<8x128xbf16>, vector<128x32xbf16>, vector<8x32xf32> -> vector<8x32xf32>
    %c0_3 = arith.constant 0 : index
    %c0_4 = arith.constant 0 : index
    %3 = vector.load %arg2[%c0_3, %c0_4] : memref<1x32xf32, #tpu.memory_space<vmem>>, vector<1x32xf32>
    %4 = vector.broadcast %3 : vector<1x32xf32> to vector<8x32xf32>
    %5 = arith.addf %2, %4 : vector<8x32xf32>
    %cst_5 = arith.constant 0.000000e+00 : f32
    %6 = vector.broadcast %cst_5 : f32 to vector<8x32xf32>
    %7 = arith.maximumf %5, %6 : vector<8x32xf32>
    %8 = vector.shape_cast %7 : vector<8x32xf32> to vector<2x4x32xf32>
    %cst_6 = arith.constant dense<0.000000e+00> : vector<2x32xf32>
    %9 = vector.multi_reduction <add>, %8, %cst_6 [1] : vector<2x4x32xf32> to vector<2x32xf32>
    %cst_7 = arith.constant 2.500000e-01 : f32
    %10 = vector.broadcast %cst_7 : f32 to vector<2x32xf32>
    %11 = arith.mulf %9, %10 : vector<2x32xf32>
    %12 = arith.truncf %11 : vector<2x32xf32> to vector<2x32xbf16>
    %c0_8 = arith.constant 0 : index
    %c0_9 = arith.constant 0 : index
    %13 = vector.load %arg3[%c0_8, %c0_9] : memref<32x128xbf16, #tpu.memory_space<vmem>>, vector<32x128xbf16>
    %cst_10 = arith.constant dense<0.000000e+00> : vector<2x128xf32>
    %14 = tpu.matmul %12, %13, %cst_10 {dimension_numbers = #tpu.dot_dimension_numbers<[1], [0], [0], [1], [0, 0, 1, 1], [], []>} : vector<2x32xbf16>, vector<32x128xbf16>, vector<2x128xf32> -> vector<2x128xf32>
    %c0_11 = arith.constant 0 : index
    %c0_12 = arith.constant 0 : index
    %15 = vector.load %arg4[%c0_11, %c0_12] : memref<1x128xf32, #tpu.memory_space<vmem>>, vector<1x128xf32>
    %16 = vector.broadcast %15 : vector<1x128xf32> to vector<2x128xf32>
    %17 = arith.addf %14, %16 : vector<2x128xf32>
    %c0_13 = arith.constant 0 : index
    %c0_14 = arith.constant 0 : index
    %18 = vector.load %arg5[%c0_13, %c0_14] : memref<2x128xf32, #tpu.memory_space<vmem>>, vector<2x128xf32>
    tpu.vector_store %arg5[%c0_13, %c0_14], %17 {strides = array<i32>} : memref<2x128xf32, #tpu.memory_space<vmem>>, vector<2x128xf32>,
    return
  }
}

</mosaic_0001>

<bundles_post_ra>
// kernel: tpu_custom_call.1
= control target key start
LH: loop header
LB: loop body
LE: loop exit
PB: predicated region body
PF: predicated region fallthrough
CT: control target
= control target key end

     0   :  { %v336_v1 = vmov 0.0   ;;  %vm337_vm0 = vmmov 0   ;;  %s420_s0 = inlined_call_operand.vmem [shape: bf16[8,128], index: 0, kind: input, shape index: {}]   ;;  %s421_s1 = inlined_call_operand.vmem [shape: bf16[128,32], index: 1, kind: input, shape index: {}]   ;;  %s422_s2 = inlined_call_operand.vmem [shape: f32[1,32], index: 2, kind: input, shape index: {}]   ;;  %s423_s3 = inlined_call_operand.vmem [shape: bf16[32,128], index: 3, kind: input, shape index: {}]   ;;  %s424_s4 = inlined_call_operand.vmem [shape: f32[1,128], index: 4, kind: input, shape index: {}]   ;;  %s425_s5 = inlined_call_operand.hbm [shape: f32[2,128], index: 5, kind: output, shape index: {}]  }
   0x1   :  { %v302_v0 = vld [vmem:[%s421_s1] sm:$0xff]   ;;  %271 = vmatprep.subr.bf16.mxu0 %v336_v1  ;;  %291 = vmatprep.subr.bf16.mxu1 %v336_v1  ;;  %v303_v2 = vld [vmem:[%s421_s1 + $0x8] sm:$0xff]   ;;  %v304_v3 = vld [vmem:[%s421_s1 + $0x10] sm:$0xff]  }
   0x2   :  { %272 = vmatpush3.bf16.msra.mxu0 %v302_v0  ;;  %287 = vmatprep.mubr.msk.bf16.mxu0 %vm337_vm0, %v336_v1  ;;  %v305_v4 = vld [vmem:[%s421_s1 + $0x18] sm:$0xff]  }
   0x3   :  { %273 = vmatprep.subr.bf16.mxu0 %v336_v1  ;;  %295 = vmatprep.mubr.msk.bf16.mxu1 %vm337_vm0, %v336_v1 }
   0x6   :  { %274 = vmatpush3.bf16.msra.mxu0 %v303_v2 }
   0x7   :  { %275 = vmatprep.subr.bf16.mxu0 %v336_v1 }
   0xa   :  { %276 = vmatpush3.bf16.msra.mxu0 %v304_v3 }
   0xb   :  { %10 = vsyncpa [#allocation3], 0  ;;  %277 = vmatprep.subr.bf16.mxu0 %v336_v1  ;;  %v306_v5 = vld [vmem:[%s421_s1 + $0x20] sm:$0xff]   ;;  %v307_v6 = vld [vmem:[%s421_s1 + $0x28] sm:$0xff]   ;;  %vm138_vm1 = vcmask 257024   ;;  %vm172_vm2 = vcmask 1041409  }
   0xc   :  { %v308_v7 = vld [vmem:[%s421_s1 + $0x30] sm:$0xff]   ;;  %v309_v8 = vld [vmem:[%s421_s1 + $0x38] sm:$0xff]   ;;  %v22_v9 = vld [vmem:[%s420_s0] sm:$0xf]  ;;  %vm187_vm3 = vcmask 261120  }
   0xd   :  { %v310_v10 = vld [vmem:[%s423_s3] sm:$0xff]   ;;  %v311_v11 = vld [vmem:[%s423_s3 + $0x8] sm:$0xff]   ;;  %s338_s3 = smov [#allocation2]  }
   0xe   :  { %278 = vmatpush3.bf16.msra.mxu0 %v305_v4  ;;  %292 = vmatpush3.bf16.msra.mxu1 %v310_v10  ;;  %v246_v12 = vld [vmem:[%s422_s2] ss:$0 sm:$0xff]  ;;  %s238_s16 = sshll.u32 %s338_s3, 4  ;;  %s239_s16 = int_to_ptr.vmem [resolvable:$true] %s238_s16 }
   0xf   :  { %279 = vmatprep.subr.bf16.mxu0 %v336_v1  ;;  %293 = vmatprep.subr.bf16.mxu1 %v336_v1  ;;  %v255_v42 = vld [vmem:[%s424_s4] ss:$0 sm:$0xff]  ;;  %s312_s17 = scalar_lea.vmem %s239_s16, 32  ;;  %p317_p1 = scmp.lt.s32.totalorder %s239_s16, %s239_s16 }
  0x10   :  { %p313_p0 = scmp.ne.s32.totalorder %s239_s16, %s312_s17  ;;  %p318_p2 = scmp.lt.s32.totalorder %s312_s17, %s312_s17 }
  0x12   :  { %280 = vmatpush3.bf16.msra.mxu0 %v306_v5  ;;  %294 = vmatpush3.bf16.msra.mxu1 %v311_v11  ;;  %p319_p3 = por %p318_p2, %p317_p1 }
  0x13   :  { %281 = vmatprep.subr.bf16.mxu0 %v336_v1 }
  0x14   :  { %p320_p4 = pnand %p319_p3, %p313_p0 }
  0x16   :  { %282 = vmatpush3.bf16.msra.mxu0 %v307_v6 }
  0x17   :  { %283 = vmatprep.subr.bf16.mxu0 %v336_v1 }
  0x1a   :  { %284 = vmatpush3.bf16.msra.mxu0 %v308_v7 }
  0x1b   :  { %285 = vmatprep.subr.bf16.mxu0 %v336_v1 }
  0x1e   :  { %286 = vmatpush3.bf16.msra.mxu0 %v309_v8 }
  0x21   :  { %288 = vmatmul.mubr.bf16.vlgmr.msra.gmra.mrb[0].mxu0 %v22_v9 }
  0xf4   :  { %v128_v13 = vpop.f32.mrb[0].mxu0 }
  0xf5   :  { %v129_v14 = vadd.f32 %v246_v12, %v128_v13  ;;  %v289_v15 = vpop.f32.mrb[1].mxu0 }
  0xf6   :  { %v131_v16 = vpop.f32.mrb[2].mxu0 }
  0xf7   :  { %v134_v17 = vmax.f32 %v129_v14, 0.0  ;;  %v290_v18 = vpop.f32.mrb[3].mxu0 }
  0xf9   :  { %v136_v19 = vcombine.high %v134_v17, %v134_v17  ;;  %v139_v20 = vsel %vm138_vm1, %v134_v17, 0.0 }
  0xfa   :  { %v140_v21 = vrot.slane %v139_v20, 4 }
  0xfb   :  { %v146_v22 = vsel %vm138_vm1, %v136_v19, 0.0 }
  0xfc   :  { %v141_v23 = vadd.f32 %v140_v21, %v139_v20  ;;  %v147_v24 = vrot.slane %v146_v22, 4 }
  0xfe   :  { %v142_v25 = vrot.slane %v141_v23, 2  ;;  %v148_v26 = vadd.f32 %v147_v24, %v146_v22 }
 0x100   :  { %v143_v27 = vadd.f32 %v142_v25, %v141_v23  ;;  %v149_v28 = vrot.slane %v148_v26, 2 }
 0x102   :  { %v144_v29 = vrot.slane %v143_v27, 1  ;;  %v150_v30 = vadd.f32 %v149_v28, %v148_v26 }
 0x104   :  { %v145_v31 = vadd.f32 %v144_v29, %v143_v27  ;;  %v151_v32 = vrot.slane %v150_v30, 1 }
 0x106   :  { %v152_v33 = vadd.f32 %v151_v32, %v150_v30  ;;  %v153_v34 = vmul.f32 0.25, %v145_v31 }
 0x108   :  { %v154_v35 = vmul.f32 0.25, %v152_v33  ;;  %v155_v36 = vpack.c.bf16 %v153_v34, %v153_v34 }
 0x10a   :  { %v156_v37 = vpack.c.bf16 %v154_v35, %v154_v35  ;;  %v170_v38 = vunpack.c.l.b16 %v155_v36 }
 0x10c   :  { %v171_v39 = vunpack.c.l.b16 %v156_v37 }
 0x10e   :  { %v173_v40 = vsel %vm172_vm2, %v171_v39, %v170_v38 }
 0x10f   :  { %v174_v41 = vpack.c.b16 %v173_v40, %v173_v40 }
 0x111   :  { %296 = vmatmul.mubr.msk.bf16.vlgmr.msra.gmra.mrb[0].mxu1 %vm187_vm3, %v174_v41 }
 0x1e4   :  { %v225_v43 = vpop.f32.mrb[0].mxu1 }
 0x1e5   :  { %v226_v44 = vadd.f32 %v255_v42, %v225_v43  ;;  %v297_v45 = vpop.f32.mrb[1].mxu1 }
 0x1e6   :  { %v228_v46 = vpop.f32.mrb[2].mxu1 }
 0x1e7   :  { %231 = vst [vmem:[#allocation2] sm:$0x3] %v226_v44  ;;  %v298_v47 = vpop.f32.mrb[3].mxu1 }
 0x1e8   :  { %323 = shalt.err (!%p320_p4)
}
 0x1e9   :  { %s324_s4 = scalar_lea.hbm %s425_s5, 32 }
 0x1ea   :  { %p325_p5 = scmp.ne.s32.totalorder %s425_s5, %s324_s4  ;;  %p328_p6 = scmp.lt.u32.totalorder %s324_s4, %s425_s5 }
 0x1ec   :  { %p330_p7 = pnand %p328_p6, %p325_p5 }
 0x1ee   :  { %333 = shalt.err (!%p330_p7)
}
 0x1ef   :  { %241 = dma.vmem_to_hbm [thread:$0]  %s239_s16, 32, %s425_s5, [#allocation3]  }
 0x1f0   :  { %334 = dma.done.wait [#allocation3], 32  }
 0x1f1   :  { %335 = vsyncadd [#allocation3], 4294967264 }
 0x1f2   :  { %245 = vsyncpa [#allocation3], 1 }

</bundles_post_ra>
